<compile_context>
chip_gen: v6e
topology: v6e:2x2x1
jax: 0.10.0
libtpu: 0.0.40
codegen_flags: <defaults>
</compile_context>

<pallas_src>
import functools

import jax
import jax.numpy as jnp
from jax.experimental import pallas as pl
from jax.experimental.pallas import tpu as pltpu


_MASK_VALUE = float(jnp.finfo(jnp.float32).min)  # matches torch.finfo(f32).min


def _pick_tile(n, preferred, align):
    """Largest tile <= preferred that divides n and is a multiple of `align`.

    Falls back to the full dimension (always a legal block size); callers
    guard the fallback against VMEM blow-ups."""
    if n <= preferred:
        return n
    t = (min(preferred, n) // align) * align
    while t >= align:
        if n % t == 0:
            return t
        t -= align
    return n


def _vmem_limit_bytes(per_step_block_bytes, scratch_bytes=0):
    """Deliberate scoped-VMEM budget: double-buffered blocks + scratch with
    headroom, clamped to a range that is sane on v5e/v6e (128 MiB physical,
    16/32 MiB default scope) and v7x (64 MiB physical)."""
    need = 2 * per_step_block_bytes + scratch_bytes
    return int(min(64 * 1024 * 1024, max(32 * 1024 * 1024, 2 * need)))


# ---------------------------------------------------------------------------
# Fused QKV projection:  out[c] = x @ w3[c]   for c in {q, k, v}, no bias.
# Output layout (3, N, E) so attention can index q/k/v per grid step without
# any XLA transpose or slice copies.
# ---------------------------------------------------------------------------
def _qkv_proj_kernel(x_ref, w_ref, o_ref):
    o_ref[0] = jnp.dot(
        x_ref[...], w_ref[0], preferred_element_type=jnp.float32
    ).astype(o_ref.dtype)


def pallas_qkv_proj(x, w3, *, tm_pref=512, tn_pref=512):
    # x: (N, E_in), w3: (3, E_in, E_out)
    n, k = x.shape
    _, _, e_out = w3.shape
    tm = _pick_tile(n, tm_pref, 8)        # sublane-aligned row tile
    tn = _pick_tile(e_out, tn_pref, 128)  # lane-aligned column tile
    gm, gn = n // tm, e_out // tn
    itemsize = x.dtype.itemsize
    step_bytes = (tm * k + k * tn + tm * tn) * itemsize

    return pl.pallas_call(
        _qkv_proj_kernel,
        out_shape=jax.ShapeDtypeStruct((3, n, e_out), x.dtype),
        grid=(gm, 3, gn),
        in_specs=[
            # x tile is re-used (not re-DMA'd) across the inner (c, j) loops.
            pl.BlockSpec((tm, k), lambda i, c, j: (i, 0)),
            pl.BlockSpec((1, k, tn), lambda i, c, j: (c, 0, j)),
        ],
        out_specs=pl.BlockSpec((1, tm, tn), lambda i, c, j: (c, i, j)),
        compiler_params=pltpu.CompilerParams(
            dimension_semantics=("parallel", "parallel", "parallel"),
            vmem_limit_bytes=_vmem_limit_bytes(step_bytes)),
        cost_estimate=pl.CostEstimate(
            flops=2 * n * k * 3 * e_out,
            transcendentals=0,
            # weights are re-streamed once per row block (gm passes)
            bytes_accessed=int(
                (n * k + gm * 3 * k * e_out + 3 * n * e_out) * itemsize)),
    )(x, w3)


# ---------------------------------------------------------------------------
# Output projection with bias:  y = x @ w + b
# ---------------------------------------------------------------------------
def _linear_bias_kernel(x_ref, w_ref, b_ref, o_ref):
    acc = jnp.dot(x_ref[...], w_ref[...], preferred_element_type=jnp.float32)
    o_ref[...] = (acc + b_ref[...].astype(jnp.float32)).astype(o_ref.dtype)


def pallas_linear_bias(x, w, b, *, tm_pref=512, tn_pref=512):
    # x: (N, K), w: (K, Nout), b: (1, Nout)
    n, k = x.shape
    _, n_out = w.shape
    tm = _pick_tile(n, tm_pref, 8)
    tn = _pick_tile(n_out, tn_pref, 128)
    gm, gn = n // tm, n_out // tn
    itemsize = x.dtype.itemsize
    step_bytes = (tm * k + k * tn + tn + tm * tn) * itemsize

    return pl.pallas_call(
        _linear_bias_kernel,
        out_shape=jax.ShapeDtypeStruct((n, n_out), x.dtype),
        grid=(gm, gn),
        in_specs=[
            pl.BlockSpec((tm, k), lambda i, j: (i, 0)),
            pl.BlockSpec((k, tn), lambda i, j: (0, j)),
            pl.BlockSpec((1, tn), lambda i, j: (0, j)),
        ],
        out_specs=pl.BlockSpec((tm, tn), lambda i, j: (i, j)),
        compiler_params=pltpu.CompilerParams(
            dimension_semantics=("parallel", "parallel"),
            vmem_limit_bytes=_vmem_limit_bytes(step_bytes)),
        cost_estimate=pl.CostEstimate(
            flops=2 * n * k * n_out,
            transcendentals=0,
            bytes_accessed=int(
                (n * k + gm * k * n_out + n * n_out + n_out) * itemsize)),
    )(x, w, b)


# ---------------------------------------------------------------------------
# Causal flash attention (online softmax), softmax_scale = 1.0.
# grid = (batch, head, q_blocks, kv_blocks); kv axis is the "arbitrary"
# reduction; heads live on the grid so every block is a single (tq|tkv, D)
# per-head tile and scratch is per-head sized.
# ---------------------------------------------------------------------------
def _flash_attn_kernel(q_ref, k_ref, v_ref, o_ref, m_sc, l_sc, acc_sc,
                       *, tq, tkv, bf16_exp):
    qi = pl.program_id(2)
    ki = pl.program_id(3)
    q_start = qi * tq
    k_start = ki * tkv

    @pl.when(ki == 0)
    def _init():
        m_sc[...] = jnp.full(m_sc.shape, _MASK_VALUE, dtype=jnp.float32)
        l_sc[...] = jnp.zeros(l_sc.shape, dtype=jnp.float32)
        acc_sc[...] = jnp.zeros(acc_sc.shape, dtype=jnp.float32)

    def _step(masked):
        q = q_ref[0, 0]                                   # (tq,  D)
        k = k_ref[0, 0]                                   # (tkv, D)
        v = v_ref[0, 0]                                   # (tkv, D)

        # Unscaled QK^T (GPT-Neo convention, softmax_scale = 1.0).
        s = jax.lax.dot_general(
            q, k, (((1,), (1,)), ((), ())),
            preferred_element_type=jnp.float32)           # (tq, tkv)

        if masked:
            # Mask work only on the diagonal-straddling blocks.
            row = jax.lax.broadcasted_iota(jnp.int32, (tq, tkv), 0) + q_start
            col = jax.lax.broadcasted_iota(jnp.int32, (tq, tkv), 1) + k_start
            s = jnp.where(col <= row, s, _MASK_VALUE)

        m_prev = m_sc[...]                                # (tq, 1) f32
        m_new = jnp.maximum(m_prev, jnp.max(s, axis=-1, keepdims=True))
        alpha = jnp.exp(m_prev - m_new)

        if bf16_exp:
            # bf16 exp -> ~2x EUP rate on v6e/v7x; stats stay f32.
            p = jnp.exp((s - m_new).astype(jnp.bfloat16))
            l_blk = jnp.sum(p.astype(jnp.float32), axis=-1, keepdims=True)
        else:
            p = jnp.exp(s - m_new)
            l_blk = jnp.sum(p, axis=-1, keepdims=True)

        l_sc[...] = alpha * l_sc[...] + l_blk
        acc_sc[...] = alpha * acc_sc[...] + jnp.dot(
            p.astype(v.dtype), v, preferred_element_type=jnp.float32)
        m_sc[...] = m_new

    # Interior blocks: fully below the diagonal -> no mask work at all.
    @pl.when(k_start + tkv <= q_start)
    def _interior():
        _step(masked=False)

    # Diagonal-straddling blocks: apply the causal mask.
    # Blocks fully above the diagonal are skipped (and their K/V index_maps
    # are clamped in the wrapper, so they also cost no DMA).
    @pl.when(jnp.logical_and(k_start + tkv > q_start, k_start < q_start + tq))
    def _diagonal():
        _step(masked=True)

    @pl.when(ki == pl.num_programs(3) - 1)
    def _store():
        # Normalize AFTER the PV matmul; exact reciprocal on (tq, 1) is free.
        inv_l = pl.reciprocal(l_sc[...], approx=False)
        o_ref[0] = (acc_sc[...] * inv_l).astype(o_ref.dtype)


def pallas_flash_attention(qkv, num_heads, *, tq_pref=256, tkv_pref=256,
                           bf16_exp=None):
    # qkv: (3, B, S, E) with E = num_heads * head_dim (q|k|v on leading axis).
    # Passed three times so each BlockSpec picks its slice / head.
    _, b, s, e = qkv.shape
    d = e // num_heads
    tq = _pick_tile(s, tq_pref, 128)
    tkv = _pick_tile(s, tkv_pref, 128)
    if max(tq, tkv) > 4096:
        raise ValueError(
            f"No 128-aligned tile divides seq_len={s}; pad the sequence "
            "instead of running with a full-length attention tile.")
    n_q, n_kv = s // tq, s // tkv

    if bf16_exp is None:
        # v6e/v7x have bf16 EUP; set bf16_exp=False explicitly on v5e.
        bf16_exp = qkv.dtype == jnp.bfloat16

    kernel = functools.partial(
        _flash_attn_kernel, tq=tq, tkv=tkv, bf16_exp=bf16_exp)

    def _kv_block(qi, ki):
        # Clamp to the diagonal block: skipped above-diagonal KV steps keep
        # the previous block index, so Pallas issues no DMA for them.
        return jnp.minimum(ki, ((qi + 1) * tq - 1) // tkv)

    q_spec = pl.BlockSpec((1, 1, tq, d),
                          lambda bi, hi, qi, ki: (0, bi, qi, hi))
    k_spec = pl.BlockSpec((1, 1, tkv, d),
                          lambda bi, hi, qi, ki: (1, bi, _kv_block(qi, ki), hi))
    v_spec = pl.BlockSpec((1, 1, tkv, d),
                          lambda bi, hi, qi, ki: (2, bi, _kv_block(qi, ki), hi))
    out_spec = pl.BlockSpec((1, tq, d),
                            lambda bi, hi, qi, ki: (bi, qi, hi))

    itemsize = qkv.dtype.itemsize
    step_bytes = (tq * d + 2 * tkv * d + tq * d) * itemsize
    scratch_bytes = (2 * tq + tq * d) * 4
    kv_passes = 0.5 * (n_q + 1)   # avg causal K/V re-reads per batch*head

    return pl.pallas_call(
        kernel,
        out_shape=jax.ShapeDtypeStruct((b, s, e), qkv.dtype),
        grid=(b, num_heads, n_q, n_kv),
        in_specs=[q_spec, k_spec, v_spec],
        out_specs=out_spec,
        scratch_shapes=[
            pltpu.VMEM((tq, 1), jnp.float32),   # running max m
            pltpu.VMEM((tq, 1), jnp.float32),   # running sum l
            pltpu.VMEM((tq, d), jnp.float32),   # f32 accumulator
        ],
        compiler_params=pltpu.CompilerParams(
            dimension_semantics=("parallel", "parallel", "parallel",
                                 "arbitrary"),
            vmem_limit_bytes=_vmem_limit_bytes(step_bytes, scratch_bytes)),
        cost_estimate=pl.CostEstimate(
            # causal: ~half of the dense 4*B*H*S*S*D flops
            flops=int(2 * b * num_heads * s * s * d),
            transcendentals=int(b * num_heads * s * s // 2),
            bytes_accessed=int(
                (2 * b * s * e + 2 * kv_passes * b * s * e) * itemsize)),
    )(qkv, qkv, qkv)


# ---------------------------------------------------------------------------
# Full module forward.
# ---------------------------------------------------------------------------
def gpt_neo_flash_attention2_forward(hidden_states, params, num_heads):
    b, s, e = hidden_states.shape
    x2 = hidden_states.reshape(b * s, e)

    # Fused Q/K/V projection -> (3, B*S, E); reshape to (3, B, S, E) is
    # metadata-only, so no split-heads transpose or slice copies in XLA.
    qkv = pallas_qkv_proj(x2, params["qkv_w"])
    qkv = qkv.reshape(3, b, s, e)

    attn = pallas_flash_attention(qkv, num_heads)        # (B, S, E), merged

    out = pallas_linear_bias(attn.reshape(b * s, e), params["o_w"],
                             params["o_b"])
    # resid_dropout / attn_dropout are identity in eval mode.
    return out.reshape(b, s, e)


# ---------------------------------------------------------------------------
# Pure-JAX f32 reference for correctness checking.
# ---------------------------------------------------------------------------
def reference_forward(x, q_w, k_w, v_w, o_w, o_b, num_heads):
    x = x.astype(jnp.float32)
    q_w, k_w, v_w, o_w, o_b = (t.astype(jnp.float32)
                               for t in (q_w, k_w, v_w, o_w, o_b))
    b, s, e = x.shape
    d = e // num_heads
    q, k, v = x @ q_w, x @ k_w, x @ v_w

    def split(t):
        return t.reshape(b, s, num_heads, d).transpose(0, 2, 1, 3)

    q, k, v = split(q), split(k), split(v)
    scores = jnp.einsum("bhqd,bhkd->bhqk", q, k)          # softmax_scale = 1.0
    mask = jnp.tril(jnp.ones((s, s), bool))
    scores = jnp.where(mask, scores, _MASK_VALUE)
    p = jax.nn.softmax(scores, axis=-1)
    o = jnp.einsum("bhqk,bhkd->bhqd", p, v)
    o = o.transpose(0, 2, 1, 3).reshape(b, s, e)
    return o @ o_w + o_b


if __name__ == "__main__":
    # Small but TPU-friendly config: hidden=256, heads=2 (head_dim=128),
    # seq=512, batch=2 -> exercises interior / diagonal / skipped KV blocks.
    B, S, E, H = 2, 512, 256, 2
    DTYPE = jnp.bfloat16   # bf16 end-to-end; f32 stats stay inside the kernel

    key = jax.random.PRNGKey(0)
    k_x, k_q, k_k, k_v, k_o, k_b = jax.random.split(key, 6)

    hidden_states = jax.random.normal(k_x, (B, S, E), dtype=jnp.float32)
    q_w = 0.02 * jax.random.normal(k_q, (E, E), dtype=jnp.float32)
    k_w = 0.02 * jax.random.normal(k_k, (E, E), dtype=jnp.float32)
    v_w = 0.02 * jax.random.normal(k_v, (E, E), dtype=jnp.float32)
    o_w = 0.02 * jax.random.normal(k_o, (E, E), dtype=jnp.float32)
    o_b = 0.02 * jax.random.normal(k_b, (E,), dtype=jnp.float32)

    # Kernel params: weights pre-transposed (E_in, E_out) == torch W.T, Q/K/V
    # stacked once at load time into (3, E, E), everything cast to bf16.
    hidden_bf = hidden_states.astype(DTYPE)
    params = {
        "qkv_w": jnp.stack([q_w, k_w, v_w], axis=0).astype(DTYPE),
        "o_w": o_w.astype(DTYPE),
        "o_b": o_b.reshape(1, E).astype(DTYPE),
    }

    out = gpt_neo_flash_attention2_forward(hidden_bf, params, H)
    out = jax.block_until_ready(out)

    # Reference computed in f32 from the same bf16-quantized inputs/params,
    # so the comparison isolates in-kernel (bf16 matmul / bf16 p) rounding.
    ref = reference_forward(hidden_bf, params["qkv_w"][0], params["qkv_w"][1],
                            params["qkv_w"][2], params["o_w"],
                            params["o_b"].reshape(E), H)

    assert out.shape == (B, S, E)
    rel_err = float(jnp.max(jnp.abs(out.astype(jnp.float32) - ref))
                    / (jnp.max(jnp.abs(ref)) + 1e-8))
    assert rel_err < 3e-2, f"relative error too large: {rel_err}"

    print("KERNEL_OK")
</pallas_src>

<mosaic_0001>
module attributes {stable_mosaic.version = 11 : i64} {
  func.func @_qkv_proj_kernel(%arg0: i32, %arg1: i32, %arg2: i32, %arg3: memref<512x256xbf16, #tpu.memory_space<vmem>>, %arg4: memref<1x256x256xbf16, #tpu.memory_space<vmem>>, %arg5: memref<1x512x256xbf16, #tpu.memory_space<vmem>>) attributes {dimension_semantics = [#tpu.dimension_semantics<parallel>, #tpu.dimension_semantics<parallel>, #tpu.dimension_semantics<parallel>], iteration_bounds = array<i64: 2, 3, 1>, scalar_prefetch = 0 : i64, scratch_operands = 0 : i64, tpu.core_type = #tpu.core_type<tc>, window_params = [{transform_indices = @transform_0, window_bounds = array<i64: 512, 256>}, {transform_indices = @transform_1, window_bounds = array<i64: 1, 256, 256>}, {transform_indices = @transform_2, window_bounds = array<i64: 1, 512, 256>}]} {
    %c0 = arith.constant 0 : index
    %c0_0 = arith.constant 0 : index
    %0 = vector.load %arg3[%c0, %c0_0] : memref<512x256xbf16, #tpu.memory_space<vmem>>, vector<512x256xbf16>
    %c0_1 = arith.constant 0 : index
    %c0_2 = arith.constant 0 : index
    %c0_3 = arith.constant 0 : index
    %1 = vector.load %arg4[%c0_1, %c0_2, %c0_3] : memref<1x256x256xbf16, #tpu.memory_space<vmem>>, vector<1x256x256xbf16>
    %2 = vector.shape_cast %1 : vector<1x256x256xbf16> to vector<256x256xbf16>
    %cst = arith.constant dense<0.000000e+00> : vector<512x256xf32>
    %3 = tpu.matmul %0, %2, %cst {dimension_numbers = #tpu.dot_dimension_numbers<[1], [0], [0], [1], [0, 0, 1, 1], [], []>} : vector<512x256xbf16>, vector<256x256xbf16>, vector<512x256xf32> -> vector<512x256xf32>
    %4 = arith.truncf %3 : vector<512x256xf32> to vector<512x256xbf16>
    %c0_4 = arith.constant 0 : index
    %c0_5 = arith.constant 0 : index
    %c0_6 = arith.constant 0 : index
    %5 = vector.load %arg5[%c0_4, %c0_5, %c0_6] : memref<1x512x256xbf16, #tpu.memory_space<vmem>>, vector<1x512x256xbf16>
    %6 = vector.shape_cast %5 : vector<1x512x256xbf16> to vector<512x256xbf16>
    %7 = vector.shape_cast %4 : vector<512x256xbf16> to vector<1x512x256xbf16>
    tpu.vector_store %arg5[%c0_4, %c0_5, %c0_6], %7 {strides = array<i32>} : memref<1x512x256xbf16, #tpu.memory_space<vmem>>, vector<1x512x256xbf16>,
    return
  }
  func.func @transform_0(%arg0: i32, %arg1: i32, %arg2: i32) -> (i32, i32) {
    %c0_i32 = arith.constant 0 : i32
    %c0_i32_0 = arith.constant 0 : i32
    return %arg0, %c0_i32 : i32, i32
  }
  func.func @transform_1(%arg0: i32, %arg1: i32, %arg2: i32) -> (i32, i32, i32) {
    %c0_i32 = arith.constant 0 : i32
    %c0_i32_0 = arith.constant 0 : i32
    return %arg1, %c0_i32, %arg2 : i32, i32, i32
  }
  func.func @transform_2(%arg0: i32, %arg1: i32, %arg2: i32) -> (i32, i32, i32) {
    %c0_i32 = arith.constant 0 : i32
    return %arg1, %arg0, %arg2 : i32, i32, i32
  }
}

</mosaic_0001>

<bundles_post_ra>
// kernel: tpu_custom_call.1
= control target key start
LH: loop header
LB: loop body
LE: loop exit
PB: predicated region body
PF: predicated region fallthrough
CT: control target
= control target key end

     0   :  { %s2998_s0 = inlined_call_operand.hbm [shape: bf16[1024,256], index: 0, kind: input, shape index: {}]   ;;  %s2999_s1 = inlined_call_operand.hbm [shape: bf16[3,256,256], index: 1, kind: input, shape index: {}]   ;;  %s3000_s2 = inlined_call_operand.hbm [shape: bf16[3,1024,256], index: 2, kind: output, shape index: {}]  }
   0x1   :  { %3009 = sst [smem:[#allocation16_spill]] %s2998_s0 }
   0x2   :  { %3010 = sst [smem:[#allocation17_spill]] %s2999_s1 }
   0x3   :  { %7 = vsyncpa [#allocation3], 0 }
   0x4   :  { %9 = vsyncpa [#allocation3 + $0x1], 0 }
   0x5   :  { %10 = vsyncpa [#allocation6], 0 }
   0x6   :  { %12 = vsyncpa [#allocation6 + $0x1], 0 }
   0x7   :  { %13 = vsyncpa [#allocation4], 0 }
   0x8   :  { %15 = vsyncpa [#allocation4 + $0x1], 0  ;;  %s2537_s9 = smov 0   ;;  %s2539_s10 = smov 0  }
   0x9   :  { %s2541_s11 = smov 0   ;;  %s2543_s12 = smov 0  }
   0xa   :  { %s2545_s13 = smov 0   ;;  %s2547_s14 = smov 0  }
   0xb   :  { %s2549_s15 = smov 0   ;;  %s2551_s16 = smov 0  }
   0xc   :  { %s2553_s17 = smov 0   ;;  %s2555_s18 = smov 0  }
   0xd   :  { %s2557_s19 = smov 0   ;;  %s2559_s20 = smov 0  }
   0xe   :  { %s2561_s21 = smov 0   ;;  %s2563_s22 = smov 0  }
   0xf LB: > { %3011 = sst [smem:[#allocation11_spill]] %s2505_s20  ;;  %s3001_s23 = sadd.s32 4294967295, %s2513_s22   ;;  %s2513_s22 = sphi %s2563_s22, %s21_s22   ;;  %s2509_s21 = sphi %s2561_s21, %s3039_s21   ;;  %s2505_s20 = sphi %s2559_s20, %s3038_s20   ;;  %s2501_s19 = sphi %s2557_s19, %s3037_s19   ;;  %s2497_s18 = sphi %s2555_s18, %s3036_s18   ;;  %s2493_s17 = sphi %s2553_s17, %s3048_s17   ;;  %s2489_s16 = sphi %s2551_s16, %s3047_s16   ;;  %s2485_s15 = sphi %s2549_s15, %s3046_s15   ;;  %s2481_s14 = sphi %s2547_s14, %s3045_s14   ;;  %s2477_s13 = sphi %s2545_s13, %s3044_s13   ;;  %s2473_s12 = sphi %s2543_s12, %s3043_s12   ;;  %s2469_s11 = sphi %s2541_s11, %s3042_s11   ;;  %s2465_s10 = sphi %s2539_s10, %s3041_s10   ;;  %s2461_s9 = sphi %s2537_s9, %s3040_s9  }
  0x10   : > { %3012 = sst [smem:[#allocation12_spill]] %s2509_s21  ;;  %p54_p0 = scmp.ne.s32.totalorder %s2493_s17, %s2489_s16 }
  0x11   : > { %p55_p1 = scmp.eq.s32.totalorder %s2513_s22, 0  ;;  %p60_p2 = scmp.ne.s32.totalorder %s2489_s16, %s2485_s15 }
  0x12   : > { %p2614_p3 = scmp.eq.s32.totalorder %s3001_s23, 0  ;;  %p2047_p6 = scmp.lt.s32.totalorder %s2513_s22, 6 }
  0x13   : > { %p56_p4 = por %p55_p1, %p54_p0  ;;  %s142_s28 = sand.u32 1, %s2493_s17  }
  0x14   : > { %p2622_p5 = por %p2614_p3, %p60_p2  ;;  %s1931_s29 = sshll.u32 %s2509_s21, 13 }
  0x15   : > { %s1752_s30 = sshll.u32 %s142_s28, 9  ;;  %s3015_s0 = sld [smem:[#allocation16_spill]] }
  0x16   : > { %s146_s6 = scalar_lea.vmem [#allocation2], %s1752_s30  ;;  %p2634_p7 = pnand %p2047_p6, %p56_p4 }
  0x17   : > { %s154_s7 = sshll.u32 %s146_s6, 4  ;;  %s143_s15 = scalar_lea.sflag [#allocation3], %s142_s28  ;;  %s155_s7 = int_to_ptr.vmem [resolvable:$true] %s154_s7 }
  0x18   : > { %p2311_p8 = pneg %p2634_p7  ;;  %s2322_s25 = scalar_lea.vmem %s155_s7, 8192 }
  0x19   : > { %p2323_p9 = scmp.ne.s32.totalorder %s155_s7, %s2322_s25  ;;  %s2515_s24 = smov [#allocation2]  }
  0x1a   : > { %s2327_s23 = sshll.u32 %s2515_s24, 4  ;;  %s2328_s23 = int_to_ptr.vmem [resolvable:$false] %s2327_s23 }
  0x1b   : > { %s153_s5 = scalar_lea.hbm %s3015_s0, %s1931_s29  ;;  %p2325_p10 = pnand %p2323_p9, %p2311_p8 }
  0x1c   : > { %s2329_s29 = scalar_lea.vmem %s2328_s23, 16384  ;;  %p2330_p12 = scmp.lt.s32.totalorder %s155_s7, %s2328_s23 }
  0x1d   : > { %p2326_p11 = pneg %p2325_p10  ;;  %p2331_p13 = scmp.lt.s32.totalorder %s2329_s29, %s2322_s25 }
  0x1f   : > { %p2332_p0 = por %p2331_p13, %p2330_p12 }
  0x21   : > { %p2333_p2 = pnand %p2332_p0, %p2326_p11 }
  0x23   : > { %2336 = shalt.err (!%p2333_p2)
}
  0x24   : > { %s3002_s30 = smov 128   ;;  %s3003_s23 = smov 8  }
  0x25   : > { %2039 = dma.hbm_to_vmem [thread:$0]  (!%p2634_p7), %s153_s5, 8192, %s155_s7, %s143_s15, %s3002_s30, %s3002_s30, %s3003_s23  }
  0x26   : > { %p1759_p4 = scmp.ge.s32.totalorder %s2513_s22, 1  ;;  %p185_p8 = scmp.lt.s32.totalorder %s2513_s22, 7 }
  0x27   : > { %s3017_s24 = sadd.s32 4294967295, %s2513_s22   ;;  %s1749_s3 = sadd.s32 4294967294, %s2513_s22  }
  0x28   : > { %p2649_p9 = scmp.eq.s32.totalorder %s3017_s24, 5  ;;  %p2653_p10 = pnand %p1759_p4, %p185_p8 }
  0x29   : > { %s36_s4 = sadd.s32 1, %s2505_s20  ;;  %s75_s5 = sadd.s32 1, %s2481_s14 }
  0x2a   : > { %p38_p7 = scmp.ge.s32.totalorder %s36_s4, 3  ;;  %p82_p11 = scmp.ne.s32.totalorder %s2481_s14, %s2477_s13 }
  0x2b   : > { %p88_p12 = scmp.ne.s32.totalorder %s2477_s13, %s2473_s12  ;;  %s3021_s6 = sadd.s32 1, %s2509_s21 }
  0x2c   : > { %s3050_s4 = smov (%p38_p7, %s36_s4), 0  ;;  %s3052_s6 = smov (!%p38_p7, %s3021_s6), %s2509_s21 }
  0x2d   : > { %3020 = sst [smem:[#allocation13_spill]] %s3050_s4  ;;  %s70_s7 = ssub.s32 %s2505_s20, %s3050_s4 }
  0x2e   : > { %s105_s8 = sadd.s32 1, %s2469_s11  ;;  %p42_p13 = scmp.ge.s32.totalorder %s3052_s6, 2 }
  0x2f   : > { %p73_p0 = scmp.eq.s32.totalorder %s70_s7, 0  ;;  %p2674_p2 = por %p88_p12, %p2614_p3 }
  0x30   : > { %p115_p4 = scmp.ne.s32.totalorder %s2469_s11, %s2465_s10  ;;  %s3054_s6 = smov (%p42_p13, %s3052_s6), 0 }
  0x31   : > { %3023 = sst [smem:[#allocation14_spill]] %s3054_s6  ;;  %s44_s29 = ssub.s32 %s2509_s21, %s3054_s6 }
  0x32   : > { %s2683_s15 = scalar_select %p73_p0, %s2481_s14, %s75_s5  }
  0x33   : > { %p2689_p8 = por %p2649_p9, %p115_p4  ;;  %p45_p7 = scmp.eq.s32.totalorder %s44_s29, 0 }
  0x34   : > { %s100_s26 = sor.u32 %s70_s7, %s44_s29  ;;  %p121_p12 = scmp.ne.s32.totalorder %s2465_s10, %s2461_s9 }
  0x35   : > { %s3024_s24 = scalar_select %p2689_p8, 1, 0 }
  0x36   : > { %p103_p3 = scmp.eq.s32.totalorder %s100_s26, 0  ;;  %s3025_s30 = sadd.s32 1, %s2493_s17 }
  0x37   : > { %s2698_s23 = scalar_select %p45_p7, %s2493_s17, %s3025_s30  }
  0x38   : > { %s2701_s0 = scalar_select %p103_p3, %s2469_s11, %s105_s8  }
  0x39   : > { %3026 = sst [smem:[#allocation15_spill]] %s2698_s23  ;;  %p122_p13 = scmp.eq.s32.totalorder %s1749_s3, 5 }
  0x3a   : > { %s164_s4 = sand.u32 1, %s2481_s14   ;;  %p84_p0 = por %p82_p11, %p55_p1 }
  0x3b   : > { %s1756_s25 = sshll.u32 %s164_s4, 8  ;;  %p2709_p9 = por %p122_p13, %p121_p12 }
  0x3c   : > { %s1932_s6 = sshll.u32 %s2505_s20, 12  ;;  %s168_s21 = scalar_lea.vmem [#allocation5], %s1756_s25 }
  0x3d   : > { %s3027_s5 = scalar_select %p2709_p9, 1, 0 }
  0x3e   : > { %s177_s7 = sshll.u32 %s168_s21, 4  ;;  %s3028_s1 = sld [smem:[#allocation17_spill]]  ;;  %s178_s7 = int_to_ptr.vmem [resolvable:$true] %s177_s7 }
  0x3f   : > { %p2719_p4 = pnand %p2047_p6, %p84_p0  ;;  %s165_s8 = scalar_lea.sflag [#allocation6], %s164_s4 }
  0x40   : > { %s2350_s23 = scalar_lea.vmem %s178_s7, 4096  ;;  %s2518_s25 = smov [#allocation5]  }
  0x41   : > { %p2339_p1 = pneg %p2719_p4  ;;  %p2351_p11 = scmp.ne.s32.totalorder %s178_s7, %s2350_s23 }
  0x42   : > { %s2355_s21 = sshll.u32 %s2518_s25, 4  ;;  %s2356_s21 = int_to_ptr.vmem [resolvable:$false] %s2355_s21 }
  0x43   : > { %p2353_p7 = pnand %p2351_p11, %p2339_p1  ;;  %s2357_s20 = scalar_lea.vmem %s2356_s21, 8192 }
  0x44   : > { %s176_s30 = scalar_lea.hbm %s3028_s1, %s1932_s6  ;;  %p2358_p12 = scmp.lt.s32.totalorder %s178_s7, %s2356_s21 }
  0x45   : > { %p2354_p3 = pneg %p2353_p7  ;;  %p2359_p13 = scmp.lt.s32.totalorder %s2357_s20, %s2350_s23 }
  0x47   : > { %p2360_p9 = por %p2359_p13, %p2358_p12 }
  0x49   : > { %p2361_p8 = pnand %p2360_p9, %p2354_p3 }
  0x4b   : > { %2364 = shalt.err (!%p2361_p8)
}
  0x4c   : > { %s3030_s6 = smov 8   ;;  %s3031_s29 = smov 128  }
  0x4d   : > { %2042 = dma.hbm_to_vmem [thread:$0]  (!%p2719_p4), %s176_s30, 4096, %s178_s7, %s165_s8, %s3031_s29, %s3031_s29, %s3030_s6  }
  0x4e   : > { %189 = sbr.rel (%p2653_p10) target bundleno = 488 (0x1e8), region = 28  ;;  %s191_s4 = sand.u32 (!%p2653_p10), 1, %s2489_s16  }
  0x4f   : > { %s1760_s26 = sshll.u32 (!%p2653_p10), %s191_s4, 9  ;;  %s192_s25 = scalar_lea.sflag (!%p2653_p10), [#allocation3], %s191_s4 }
  0x50   : > { %s2733_s1 = scalar_lea.vmem (!%p2653_p10), [#allocation2], %s1760_s26 }
  0x53   : > { %2448 = dma.done.wait (%p2622_p5), %s192_s25, 8192  }
  0x54   : > { %2450 = vsyncadd (%p2622_p5), %s192_s25, 4294959104  ;;  %s200_s20 = sand.u32 1, %s2477_s13  }
  0x55   : > { %s1761_s23 = sshll.u32 %s200_s20, 8  ;;  %s201_s7 = scalar_lea.sflag [#allocation6], %s200_s20 }
  0x56   : > { %s2740_s30 = scalar_lea.vmem [#allocation5], %s1761_s23 }
  0x57   : > { %2452 = dma.done.wait (%p2674_p2), %s201_s7, 4096  }
  0x58   : > { %2454 = vsyncadd (%p2674_p2), %s201_s7, 4294963200  ;;  %v2165_v0 = vld [vmem:[%s2740_s30 + $0x74] ss:$8 sps:$4 sm:$0xff]   ;;  %v2167_v1 = vld [vmem:[%s2740_s30 + $0x70] ss:$8 sps:$4 sm:$0xff]   ;;  %s227_s27 = sand.u32 1, %s2465_s10  }
  0x59   : > { %810 = vmatprep.subr.bf16.mxu0 %v2165_v0  ;;  %1998 = vmatprep.subr.bf16.mxu1 %v2165_v0  ;;  %v2168_v2 = vld [vmem:[%s2740_s30 + $0x64] ss:$8 sps:$4 sm:$0xff]   ;;  %v2170_v3 = vld [vmem:[%s2740_s30 + $0x60] ss:$8 sps:$4 sm:$0xff]   ;;  %v2171_v4 = vld [vmem:[%s2740_s30 + $0x54] ss:$8 sps:$4 sm:$0xff]  }
  0x5a   : > { %811 = vmatpush1.bf16.msra.mxu0 %v2167_v1  ;;  %2014 = vmatpush1.bf16.msra.mxu1 %v2167_v1  ;;  %v2173_v5 = vld [vmem:[%s2740_s30 + $0x50] ss:$8 sps:$4 sm:$0xff]   ;;  %v2174_v6 = vld [vmem:[%s2740_s30 + $0x44] ss:$8 sps:$4 sm:$0xff]   ;;  %v2176_v7 = vld [vmem:[%s2740_s30 + $0x40] ss:$8 sps:$4 sm:$0xff]  }
  0x5b   : > { %812 = vmatprep.subr.bf16.mxu0 %v2168_v2  ;;  %1999 = vmatprep.subr.bf16.mxu1 %v2168_v2  ;;  %v2177_v8 = vld [vmem:[%s2740_s30 + $0x34] ss:$8 sps:$4 sm:$0xff]   ;;  %v2179_v9 = vld [vmem:[%s2740_s30 + $0x30] ss:$8 sps:$4 sm:$0xff]   ;;  %v2180_v10 = vld [vmem:[%s2740_s30 + $0x24] ss:$8 sps:$4 sm:$0xff]  }
  0x5c   : > { %v2182_v11 = vld [vmem:[%s2740_s30 + $0x20] ss:$8 sps:$4 sm:$0xff]   ;;  %v2183_v12 = vld [vmem:[%s2740_s30 + $0x14] ss:$8 sps:$4 sm:$0xff]   ;;  %v2215_v13 = vld [vmem:[%s2733_s1 + $0x4] ss:$8 sps:$4 sm:$0xff]  }
  0x5d   : > { %v2185_v14 = vld [vmem:[%s2740_s30 + $0x10] ss:$8 sps:$4 sm:$0xff]   ;;  %v2218_v15 = vld [vmem:[%s2733_s1 + $0x104] ss:$8 sps:$4 sm:$0xff]   ;;  %842 = vmatprep.mubr.bf16.mxu0 %v2215_v13  ;;  %v2188_v17 = vld [vmem:[%s2740_s30] ss:$8 sps:$4 sm:$0xff]  }
  0x5e   : > { %813 = vmatpush1.bf16.msra.mxu0 %v2170_v3  ;;  %2015 = vmatpush1.bf16.msra.mxu1 %v2170_v3  ;;  %v2186_v16 = vld [vmem:[%s2740_s30 + $0x4] ss:$8 sps:$4 sm:$0xff]   ;;  %v2189_v18 = vld [vmem:[%s2740_s30 + $0xf4] ss:$8 sps:$4 sm:$0xff]   ;;  %v2191_v19 = vld [vmem:[%s2740_s30 + $0xf0] ss:$8 sps:$4 sm:$0xff]  }
  0x5f   : > { %814 = vmatprep.subr.bf16.mxu0 %v2171_v4  ;;  %2000 = vmatprep.subr.bf16.mxu1 %v2171_v4  ;;  %v2192_v20 = vld [vmem:[%s2740_s30 + $0xe4] ss:$8 sps:$4 sm:$0xff]   ;;  %v2194_v21 = vld [vmem:[%s2740_s30 + $0xe0] ss:$8 sps:$4 sm:$0xff]   ;;  %v2195_v22 = vld [vmem:[%s2740_s30 + $0xd4] ss:$8 sps:$4 sm:$0xff]  }
  0x60   : > { %1002 = vmatprep.mubr.bf16.mxu1 %v2218_v15  ;;  %v2197_v23 = vld [vmem:[%s2740_s30 + $0xd0] ss:$8 sps:$4 sm:$0xff]   ;;  %v2198_v24 = vld [vmem:[%s2740_s30 + $0xc4] ss:$8 sps:$4 sm:$0xff]   ;;  %v2200_v25 = vld [vmem:[%s2740_s30 + $0xc0] ss:$8 sps:$4 sm:$0xff]  }
  0x61   : > { %v2201_v26 = vld [vmem:[%s2740_s30 + $0xb4] ss:$8 sps:$4 sm:$0xff]   ;;  %v2203_v27 = vld [vmem:[%s2740_s30 + $0xb0] ss:$8 sps:$4 sm:$0xff]   ;;  %v2204_v28 = vld [vmem:[%s2740_s30 + $0xa4] ss:$8 sps:$4 sm:$0xff]  }
  0x62   : > { %815 = vmatpush1.bf16.msra.mxu0 %v2173_v5  ;;  %2016 = vmatpush1.bf16.msra.mxu1 %v2173_v5  ;;  %v2206_v29 = vld [vmem:[%s2740_s30 + $0xa0] ss:$8 sps:$4 sm:$0xff]   ;;  %v2207_v30 = vld [vmem:[%s2740_s30 + $0x94] ss:$8 sps:$4 sm:$0xff]   ;;  %v2209_v31 = vld [vmem:[%s2740_s30 + $0x90] ss:$8 sps:$4 sm:$0xff]  }
  0x63   : > { %816 = vmatprep.subr.bf16.mxu0 %v2174_v6  ;;  %2001 = vmatprep.subr.bf16.mxu1 %v2174_v6  ;;  %v2210_v32 = vld [vmem:[%s2740_s30 + $0x84] ss:$8 sps:$4 sm:$0xff]   ;;  %v2212_v33 = vld [vmem:[%s2740_s30 + $0x80] ss:$8 sps:$4 sm:$0xff]   ;;  %v2219_v36 = vld [vmem:[%s2733_s1 + $0x14] ss:$8 sps:$4 sm:$0xff]  }
  0x64   : > { %v2213_v34 = vld [vmem:[%s2733_s1] ss:$8 sps:$4 sm:$0xff]   ;;  %v2221_v37 = vld [vmem:[%s2733_s1 + $0x114] ss:$8 sps:$4 sm:$0xff]   ;;  %v2223_v38 = vld [vmem:[%s2733_s1 + $0x10] ss:$8 sps:$4 sm:$0xff]  }
  0x65   : > { %v2216_v35 = vld [vmem:[%s2733_s1 + $0x100] ss:$8 sps:$4 sm:$0xff]   ;;  %v2224_v39 = vld [vmem:[%s2733_s1 + $0x110] ss:$8 sps:$4 sm:$0xff]   ;;  %v2225_v40 = vld [vmem:[%s2733_s1 + $0x24] ss:$8 sps:$4 sm:$0xff]  }
  0x66   : > { %817 = vmatpush1.bf16.msra.mxu0 %v2176_v7  ;;  %2017 = vmatpush1.bf16.msra.mxu1 %v2176_v7  ;;  %v2227_v41 = vld [vmem:[%s2733_s1 + $0x124] ss:$8 sps:$4 sm:$0xff]   ;;  %v2229_v42 = vld [vmem:[%s2733_s1 + $0x20] ss:$8 sps:$4 sm:$0xff]   ;;  %v2231_v44 = vld [vmem:[%s2733_s1 + $0x34] ss:$8 sps:$4 sm:$0xff]  }
  0x67   : > { %818 = vmatprep.subr.bf16.mxu0 %v2177_v8  ;;  %2002 = vmatprep.subr.bf16.mxu1 %v2177_v8  ;;  %v2230_v43 = vld [vmem:[%s2733_s1 + $0x120] ss:$8 sps:$4 sm:$0xff]   ;;  %v2233_v45 = vld [vmem:[%s2733_s1 + $0x134] ss:$8 sps:$4 sm:$0xff]   ;;  %v2235_v46 = vld [vmem:[%s2733_s1 + $0x30] ss:$8 sps:$4 sm:$0xff]  }
  0x68   : > { %v2236_v47 = vld [vmem:[%s2733_s1 + $0x130] ss:$8 sps:$4 sm:$0xff]   ;;  %v2237_v48 = vld [vmem:[%s2733_s1 + $0x44] ss:$8 sps:$4 sm:$0xff]   ;;  %v2241_v50 = vld [vmem:[%s2733_s1 + $0x40] ss:$8 sps:$4 sm:$0xff]  }
  0x69   : > { %v2239_v49 = vld [vmem:[%s2733_s1 + $0x144] ss:$8 sps:$4 sm:$0xff]   ;;  %v2242_v51 = vld [vmem:[%s2733_s1 + $0x140] ss:$8 sps:$4 sm:$0xff]   ;;  %v2243_v52 = vld [vmem:[%s2733_s1 + $0x54] ss:$8 sps:$4 sm:$0xff]  }
  0x6a   : > { %819 = vmatpush1.bf16.msra.mxu0 %v2179_v9  ;;  %2018 = vmatpush1.bf16.msra.mxu1 %v2179_v9  ;;  %v2245_v53 = vld [vmem:[%s2733_s1 + $0x154] ss:$8 sps:$4 sm:$0xff]   ;;  %v2247_v54 = vld [vmem:[%s2733_s1 + $0x50] ss:$8 sps:$4 sm:$0xff]   ;;  %v2249_v56 = vld [vmem:[%s2733_s1 + $0x64] ss:$8 sps:$4 sm:$0xff]  }
  0x6b   : > { %820 = vmatprep.subr.bf16.mxu0 %v2180_v10  ;;  %2003 = vmatprep.subr.bf16.mxu1 %v2180_v10  ;;  %v2248_v55 = vld [vmem:[%s2733_s1 + $0x150] ss:$8 sps:$4 sm:$0xff]   ;;  %v2251_v57 = vld [vmem:[%s2733_s1 + $0x164] ss:$8 sps:$4 sm:$0xff]   ;;  %v2253_v58 = vld [vmem:[%s2733_s1 + $0x60] ss:$8 sps:$4 sm:$0xff]  }
  0x6c   : > { %v2254_v59 = vld [vmem:[%s2733_s1 + $0x160] ss:$8 sps:$4 sm:$0xff]   ;;  %v2255_v60 = vld [vmem:[%s2733_s1 + $0x74] ss:$8 sps:$4 sm:$0xff]   ;;  %v2259_v62 = vld [vmem:[%s2733_s1 + $0x70] ss:$8 sps:$4 sm:$0xff]  }
  0x6d   : > { %v2257_v61 = vld [vmem:[%s2733_s1 + $0x174] ss:$8 sps:$4 sm:$0xff]   ;;  %v2260_v63 = vld [vmem:[%s2733_s1 + $0x170] ss:$8 sps:$4 sm:$0xff]   ;;  %v2261_v0 = vld [vmem:[%s2733_s1 + $0x84] ss:$8 sps:$4 sm:$0xff]  }
  0x6e   : > { %821 = vmatpush1.bf16.msra.mxu0 %v2182_v11  ;;  %2019 = vmatpush1.bf16.msra.mxu1 %v2182_v11  ;;  %v2263_v1 = vld [vmem:[%s2733_s1 + $0x184] ss:$8 sps:$4 sm:$0xff]   ;;  %v2265_v2 = vld [vmem:[%s2733_s1 + $0x80] ss:$8 sps:$4 sm:$0xff]   ;;  %v2267_v4 = vld [vmem:[%s2733_s1 + $0x94] ss:$8 sps:$4 sm:$0xff]  }
  0x6f   : > { %822 = vmatprep.subr.bf16.mxu0 %v2183_v12  ;;  %2004 = vmatprep.subr.bf16.mxu1 %v2183_v12  ;;  %v2266_v3 = vld [vmem:[%s2733_s1 + $0x180] ss:$8 sps:$4 sm:$0xff]   ;;  %v2269_v5 = vld [vmem:[%s2733_s1 + $0x194] ss:$8 sps:$4 sm:$0xff]   ;;  %v2271_v6 = vld [vmem:[%s2733_s1 + $0x90] ss:$8 sps:$4 sm:$0xff]  }
  0x70   : > { %v2272_v7 = vld [vmem:[%s2733_s1 + $0x190] ss:$8 sps:$4 sm:$0xff]   ;;  %v2273_v8 = vld [vmem:[%s2733_s1 + $0xa4] ss:$8 sps:$4 sm:$0xff]   ;;  %v2277_v10 = vld [vmem:[%s2733_s1 + $0xa0] ss:$8 sps:$4 sm:$0xff]  }
  0x71   : > { %v2275_v9 = vld [vmem:[%s2733_s1 + $0x1a4] ss:$8 sps:$4 sm:$0xff]   ;;  %v2278_v11 = vld [vmem:[%s2733_s1 + $0x1a0] ss:$8 sps:$4 sm:$0xff]   ;;  %v2279_v12 = vld [vmem:[%s2733_s1 + $0xb4] ss:$8 sps:$4 sm:$0xff]  }
  0x72   : > { %823 = vmatpush1.bf16.msra.mxu0 %v2185_v14  ;;  %2020 = vmatpush1.bf16.msra.mxu1 %v2185_v14  ;;  %v2281_v13 = vld [vmem:[%s2733_s1 + $0x1b4] ss:$8 sps:$4 sm:$0xff]   ;;  %v2283_v14 = vld [vmem:[%s2733_s1 + $0xb0] ss:$8 sps:$4 sm:$0xff]   ;;  %s1762_s28 = sshll.u32 %s227_s27, 9  ;;  %s1926_s3 = sshll.u32 %s2497_s18, 8 }
  0x73   : > { %824 = vmatprep.subr.bf16.mxu0 %v2186_v16  ;;  %2005 = vmatprep.subr.bf16.mxu1 %v2186_v16  ;;  %v2284_v15 = vld [vmem:[%s2733_s1 + $0x1b0] ss:$8 sps:$4 sm:$0xff]   ;;  %v2285_v16 = vld [vmem:[%s2733_s1 + $0xc4] ss:$8 sps:$4 sm:$0xff]   ;;  %s2845_s12 = scalar_lea.vmem [#allocation7], %s1762_s28  ;;  %s2923_s4 = scalar_lea.sflag [#allocation4], %s227_s27 }
  0x74   : > { %s1630_s18 = sshll.u32 %s2845_s12, 4  ;;  %p3032_p6 = scmp.ne.s32.totalorder %s3024_s24, 0  ;;  %s2917_s18 = int_to_ptr.vmem [resolvable:$true] %s1630_s18 }
  0x75   : > { %s2365_s26 = scalar_lea.vmem %s2917_s18, 8192  ;;  %s2519_s25 = smov [#allocation7]  }
  0x76   : > { %825 = vmatpush1.bf16.msra.mxu0 %v2188_v17  ;;  %2021 = vmatpush1.bf16.msra.mxu1 %v2188_v17  ;;  %v2287_v17 = vld [vmem:[%s2733_s1 + $0x1c4] ss:$8 sps:$4 sm:$0xff]   ;;  %p2366_p5 = scmp.ne.s32.totalorder %s2917_s18, %s2365_s26  ;;  %s2369_s20 = sshll.u32 %s2519_s25, 4  ;;  %s2370_s20 = int_to_ptr.vmem [resolvable:$false] %s2369_s20 }
  0x77   : > { %826 = vmatprep.subr.bf16.mxu0 %v2189_v18  ;;  %2006 = vmatprep.subr.bf16.mxu1 %v2189_v18  ;;  %v2289_v18 = vld [vmem:[%s2733_s1 + $0xc0] ss:$8 sps:$4 sm:$0xff]   ;;  %s2371_s23 = scalar_lea.vmem %s2370_s20, 16384  ;;  %p2372_p8 = scmp.lt.s32.totalorder %s2917_s18, %s2370_s20 }
  0x78   : > { %p2367_p10 = pnand %p2366_p5, %p3032_p6  ;;  %p2373_p0 = scmp.lt.s32.totalorder %s2371_s23, %s2365_s26 }
  0x7a   : > { %827 = vmatpush2.bf16.msra.mxu0 %v2191_v19  ;;  %2022 = vmatpush2.bf16.msra.mxu1 %v2191_v19  ;;  %v2290_v19 = vld [vmem:[%s2733_s1 + $0x1c0] ss:$8 sps:$4 sm:$0xff]   ;;  %p2368_p2 = pneg %p2367_p10  ;;  %p2374_p9 = por %p2373_p0, %p2372_p8 }
  0x7b   : > { %828 = vmatprep.subr.bf16.mxu0 %v2192_v20  ;;  %2007 = vmatprep.subr.bf16.mxu1 %v2192_v20  ;;  %v2291_v20 = vld [vmem:[%s2733_s1 + $0xd4] ss:$8 sps:$4 sm:$0xff]  }
  0x7c   : > { %p2375_p4 = pnand %p2374_p9, %p2368_p2 }
  0x7e   : > { %829 = vmatpush2.bf16.msra.mxu0 %v2194_v21  ;;  %2023 = vmatpush2.bf16.msra.mxu1 %v2194_v21  ;;  %v2293_v21 = vld [vmem:[%s2733_s1 + $0x1d4] ss:$8 sps:$4 sm:$0xff]  }
  0x7f   : > { %830 = vmatprep.subr.bf16.mxu0 %v2195_v22  ;;  %2008 = vmatprep.subr.bf16.mxu1 %v2195_v22  ;;  %v2295_v22 = vld [vmem:[%s2733_s1 + $0xd0] ss:$8 sps:$4 sm:$0xff]  }
  0x82   : > { %831 = vmatpush2.bf16.msra.mxu0 %v2197_v23  ;;  %2024 = vmatpush2.bf16.msra.mxu1 %v2197_v23  ;;  %v2296_v23 = vld [vmem:[%s2733_s1 + $0x1d0] ss:$8 sps:$4 sm:$0xff]  }
  0x83   : > { %832 = vmatprep.subr.bf16.mxu0 %v2198_v24  ;;  %2009 = vmatprep.subr.bf16.mxu1 %v2198_v24  ;;  %v2297_v24 = vld [vmem:[%s2733_s1 + $0xe4] ss:$8 sps:$4 sm:$0xff]  }
  0x86   : > { %833 = vmatpush2.bf16.msra.mxu0 %v2200_v25  ;;  %2025 = vmatpush2.bf16.msra.mxu1 %v2200_v25  ;;  %v2299_v25 = vld [vmem:[%s2733_s1 + $0x1e4] ss:$8 sps:$4 sm:$0xff]  }
  0x87   : > { %834 = vmatprep.subr.bf16.mxu0 %v2201_v26  ;;  %2010 = vmatprep.subr.bf16.mxu1 %v2201_v26  ;;  %v2301_v26 = vld [vmem:[%s2733_s1 + $0xe0] ss:$8 sps:$4 sm:$0xff]  }
  0x8a   : > { %835 = vmatpush2.bf16.msra.mxu0 %v2203_v27  ;;  %2026 = vmatpush2.bf16.msra.mxu1 %v2203_v27  ;;  %v2302_v27 = vld [vmem:[%s2733_s1 + $0x1e0] ss:$8 sps:$4 sm:$0xff]  }
  0x8b   : > { %836 = vmatprep.subr.bf16.mxu0 %v2204_v28  ;;  %2011 = vmatprep.subr.bf16.mxu1 %v2204_v28  ;;  %v2303_v28 = vld [vmem:[%s2733_s1 + $0xf4] ss:$8 sps:$4 sm:$0xff]  }
  0x8e   : > { %837 = vmatpush2.bf16.msra.mxu0 %v2206_v29  ;;  %2027 = vmatpush2.bf16.msra.mxu1 %v2206_v29  ;;  %v2305_v29 = vld [vmem:[%s2733_s1 + $0x1f4] ss:$8 sps:$4 sm:$0xff]  }
  0x8f   : > { %838 = vmatprep.subr.bf16.mxu0 %v2207_v30  ;;  %2012 = vmatprep.subr.bf16.mxu1 %v2207_v30  ;;  %v2307_v30 = vld [vmem:[%s2733_s1 + $0xf0] ss:$8 sps:$4 sm:$0xff]  }
  0x92   : > { %839 = vmatpush2.bf16.msra.mxu0 %v2209_v31  ;;  %2028 = vmatpush2.bf16.msra.mxu1 %v2209_v31  ;;  %v2308_v31 = vld [vmem:[%s2733_s1 + $0x1f0] ss:$8 sps:$4 sm:$0xff]   ;;  %s1997_s1 = sshll.u32 %s2501_s19, 7 }
  0x93   : > { %840 = vmatprep.subr.bf16.mxu0 %v2210_v32  ;;  %2013 = vmatprep.subr.bf16.mxu1 %v2210_v32  ;;  %s1627_s8 = sadd.s32 %s1997_s1, %s1926_s3 }
  0x94   : > { %s1927_s19 = sshll.u32 %s1627_s8, 6 }
  0x95   : > { %s2915_s29 = scalar_lea.hbm %s3000_s2, %s1927_s19 }
  0x96   : > { %841 = vmatpush2.bf16.msra.mxu0 %v2212_v33  ;;  %2029 = vmatpush2.bf16.msra.mxu1 %v2212_v33 }
  0x99   : > { %843 = vmatmul.mubr.bf16.vlgmr.msra.gmra.mxu0 %v2213_v34  ;;  %1003 = vmatmul.mubr.bf16.vlgmr.msra.gmra.mxu1 %v2216_v35 }
  0x9a   : > { %852 = vmatprep.mubr.bf16.mxu0 %v2219_v36  ;;  %1012 = vmatprep.mubr.bf16.mxu1 %v2221_v37 }
  0xa1   : > { %853 = vmatmul.mubr.bf16.gmra.mxu0 %v2223_v38  ;;  %1013 = vmatmul.mubr.bf16.gmra.mxu1 %v2224_v39 }
  0xa2   : > { %862 = vmatprep.mubr.bf16.mxu0 %v2225_v40  ;;  %1022 = vmatprep.mubr.bf16.mxu1 %v2227_v41 }
  0xa9   : > { %863 = vmatmul.mubr.bf16.gmra.mxu0 %v2229_v42  ;;  %1023 = vmatmul.mubr.bf16.gmra.mxu1 %v2230_v43 }
  0xaa   : > { %872 = vmatprep.mubr.bf16.mxu0 %v2231_v44  ;;  %1032 = vmatprep.mubr.bf16.mxu1 %v2233_v45 }
  0xb1   : > { %873 = vmatmul.mubr.bf16.gmra.mxu0 %v2235_v46  ;;  %1033 = vmatmul.mubr.bf16.gmra.mxu1 %v2236_v47 }
  0xb2   : > { %882 = vmatprep.mubr.bf16.mxu0 %v2237_v48  ;;  %1042 = vmatprep.mubr.bf16.mxu1 %v2239_v49 }
  0xb9   : > { %883 = vmatmul.mubr.bf16.gmra.mxu0 %v2241_v50  ;;  %1043 = vmatmul.mubr.bf16.gmra.mxu1 %v2242_v51 }
  0xba   : > { %892 = vmatprep.mubr.bf16.mxu0 %v2243_v52  ;;  %1052 = vmatprep.mubr.bf16.mxu1 %v2245_v53 }
  0xc1   : > { %893 = vmatmul.mubr.bf16.gmra.mxu0 %v2247_v54  ;;  %1053 = vmatmul.mubr.bf16.gmra.mxu1 %v2248_v55 }
  0xc2   : > { %902 = vmatprep.mubr.bf16.mxu0 %v2249_v56  ;;  %1062 = vmatprep.mubr.bf16.mxu1 %v2251_v57 }
  0xc9   : > { %903 = vmatmul.mubr.bf16.gmra.mxu0 %v2253_v58  ;;  %1063 = vmatmul.mubr.bf16.gmra.mxu1 %v2254_v59 }
  0xca   : > { %912 = vmatprep.mubr.bf16.mxu0 %v2255_v60  ;;  %1072 = vmatprep.mubr.bf16.mxu1 %v2257_v61 }
  0xd1   : > { %913 = vmatmul.mubr.bf16.gmra.mxu0 %v2259_v62  ;;  %1073 = vmatmul.mubr.bf16.gmra.mxu1 %v2260_v63 }
  0xd2   : > { %922 = vmatprep.mubr.bf16.mxu0 %v2261_v0  ;;  %1082 = vmatprep.mubr.bf16.mxu1 %v2263_v1 }
  0xd9   : > { %923 = vmatmul.mubr.bf16.gmra.mxu0 %v2265_v2  ;;  %1083 = vmatmul.mubr.bf16.gmra.mxu1 %v2266_v3 }
  0xda   : > { %932 = vmatprep.mubr.bf16.mxu0 %v2267_v4  ;;  %1092 = vmatprep.mubr.bf16.mxu1 %v2269_v5 }
  0xe1   : > { %933 = vmatmul.mubr.bf16.gmra.mxu0 %v2271_v6  ;;  %1093 = vmatmul.mubr.bf16.gmra.mxu1 %v2272_v7 }
  0xe2   : > { %942 = vmatprep.mubr.bf16.mxu0 %v2273_v8  ;;  %1102 = vmatprep.mubr.bf16.mxu1 %v2275_v9 }
  0xe9   : > { %943 = vmatmul.mubr.bf16.gmra.mxu0 %v2277_v10  ;;  %1103 = vmatmul.mubr.bf16.gmra.mxu1 %v2278_v11 }
  0xea   : > { %952 = vmatprep.mubr.bf16.mxu0 %v2279_v12  ;;  %1112 = vmatprep.mubr.bf16.mxu1 %v2281_v13 }
  0xf1   : > { %953 = vmatmul.mubr.bf16.gmra.mxu0 %v2283_v14  ;;  %1113 = vmatmul.mubr.bf16.gmra.mxu1 %v2284_v15 }
  0xf2   : > { %962 = vmatprep.mubr.bf16.mxu0 %v2285_v16  ;;  %1122 = vmatprep.mubr.bf16.mxu1 %v2287_v17 }
  0xf9   : > { %963 = vmatmul.mubr.bf16.gmra.mxu0 %v2289_v18  ;;  %1123 = vmatmul.mubr.bf16.gmra.mxu1 %v2290_v19 }
  0xfa   : > { %972 = vmatprep.mubr.bf16.mxu0 %v2291_v20  ;;  %1132 = vmatprep.mubr.bf16.mxu1 %v2293_v21 }
 0x101   : > { %973 = vmatmul.mubr.bf16.gmra.mxu0 %v2295_v22  ;;  %1133 = vmatmul.mubr.bf16.gmra.mxu1 %v2296_v23 }
 0x102   : > { %982 = vmatprep.mubr.bf16.mxu0 %v2297_v24  ;;  %1142 = vmatprep.mubr.bf16.mxu1 %v2299_v25 }
 0x109   : > { %983 = vmatmul.mubr.bf16.gmra.mxu0 %v2301_v26  ;;  %1143 = vmatmul.mubr.bf16.gmra.mxu1 %v2302_v27 }
 0x10a   : > { %992 = vmatprep.mubr.bf16.mxu0 %v2303_v28  ;;  %1152 = vmatprep.mubr.bf16.mxu1 %v2305_v29 }
 0x111   : > { %993 = vmatmul.mubr.bf16.gmra.mxu0 %v2307_v30  ;;  %1153 = vmatmul.mubr.bf16.gmra.mxu1 %v2308_v31 }
 0x159   : > { %v844_v32 = vpop.f32.mrf.mxu0  ;;  %v1004_v33 = vpop.f32.mrf.mxu1 }
 0x15b   : > { %v846_v34 = vpop.f32.mrf.mxu0  ;;  %v1006_v35 = vpop.f32.mrf.mxu1 }
 0x15c   : > { %v1933_v36 = vpack.c.bf16 %v846_v34, %v844_v32  ;;  %v1965_v37 = vpack.c.bf16 %v1006_v35, %v1004_v33 }
 0x15d   : > { %v848_v38 = vpop.f32.mrf.mxu0  ;;  %v1008_v39 = vpop.f32.mrf.mxu1 }
 0x15e   : > { %1547 = vst [vmem:[%s2845_s12] sm:$0xff] %v1933_v36  ;;  %1579 = vst [vmem:[%s2845_s12 + $0x100] sm:$0xff] %v1965_v37 }
 0x15f   : > { %v850_v40 = vpop.f32.mrf.mxu0  ;;  %v1010_v41 = vpop.f32.mrf.mxu1 }
 0x160   : > { %v1934_v42 = vpack.c.bf16 %v850_v40, %v848_v38  ;;  %v1966_v43 = vpack.c.bf16 %v1010_v41, %v1008_v39 }
 0x161   : > { %v854_v44 = vpop.f32.mrf.mxu0  ;;  %v1014_v45 = vpop.f32.mrf.mxu1 }
 0x162   : > { %1548 = vst [vmem:[%s2845_s12 + $0x8] sm:$0xff] %v1934_v42  ;;  %1580 = vst [vmem:[%s2845_s12 + $0x108] sm:$0xff] %v1966_v43 }
 0x163   : > { %v856_v46 = vpop.f32.mrf.mxu0  ;;  %v1016_v47 = vpop.f32.mrf.mxu1 }
 0x164   : > { %v1935_v48 = vpack.c.bf16 %v856_v46, %v854_v44  ;;  %v1967_v49 = vpack.c.bf16 %v1016_v47, %v1014_v45 }
 0x165   : > { %v858_v50 = vpop.f32.mrf.mxu0  ;;  %v1018_v51 = vpop.f32.mrf.mxu1 }
 0x166   : > { %1549 = vst [vmem:[%s2845_s12 + $0x10] sm:$0xff] %v1935_v48  ;;  %1581 = vst [vmem:[%s2845_s12 + $0x110] sm:$0xff] %v1967_v49 }
 0x167   : > { %v860_v52 = vpop.f32.mrf.mxu0  ;;  %v1020_v53 = vpop.f32.mrf.mxu1 }
 0x168   : > { %v1936_v54 = vpack.c.bf16 %v860_v52, %v858_v50  ;;  %v1968_v55 = vpack.c.bf16 %v1020_v53, %v1018_v51 }
 0x169   : > { %v864_v56 = vpop.f32.mrf.mxu0  ;;  %v1024_v57 = vpop.f32.mrf.mxu1 }
 0x16a   : > { %1550 = vst [vmem:[%s2845_s12 + $0x18] sm:$0xff] %v1936_v54  ;;  %1582 = vst [vmem:[%s2845_s12 + $0x118] sm:$0xff] %v1968_v55 }
 0x16b   : > { %v866_v58 = vpop.f32.mrf.mxu0  ;;  %v1026_v59 = vpop.f32.mrf.mxu1 }
 0x16c   : > { %v1937_v60 = vpack.c.bf16 %v866_v58, %v864_v56  ;;  %v1969_v61 = vpack.c.bf16 %v1026_v59, %v1024_v57 }
 0x16d   : > { %v868_v62 = vpop.f32.mrf.mxu0  ;;  %v1028_v63 = vpop.f32.mrf.mxu1 }
 0x16e   : > { %1551 = vst [vmem:[%s2845_s12 + $0x20] sm:$0xff] %v1937_v60  ;;  %1583 = vst [vmem:[%s2845_s12 + $0x120] sm:$0xff] %v1969_v61 }
 0x16f   : > { %v870_v0 = vpop.f32.mrf.mxu0  ;;  %v1030_v1 = vpop.f32.mrf.mxu1 }
 0x170   : > { %v1938_v2 = vpack.c.bf16 %v870_v0, %v868_v62  ;;  %v1970_v3 = vpack.c.bf16 %v1030_v1, %v1028_v63 }
 0x171   : > { %v874_v4 = vpop.f32.mrf.mxu0  ;;  %v1034_v5 = vpop.f32.mrf.mxu1 }
 0x172   : > { %1552 = vst [vmem:[%s2845_s12 + $0x28] sm:$0xff] %v1938_v2  ;;  %1584 = vst [vmem:[%s2845_s12 + $0x128] sm:$0xff] %v1970_v3 }
 0x173   : > { %v876_v6 = vpop.f32.mrf.mxu0  ;;  %v1036_v7 = vpop.f32.mrf.mxu1 }
 0x174   : > { %v1939_v8 = vpack.c.bf16 %v876_v6, %v874_v4  ;;  %v1971_v9 = vpack.c.bf16 %v1036_v7, %v1034_v5 }
 0x175   : > { %v878_v10 = vpop.f32.mrf.mxu0  ;;  %v1038_v11 = vpop.f32.mrf.mxu1 }
 0x176   : > { %1553 = vst [vmem:[%s2845_s12 + $0x30] sm:$0xff] %v1939_v8  ;;  %1585 = vst [vmem:[%s2845_s12 + $0x130] sm:$0xff] %v1971_v9 }
 0x177   : > { %v880_v12 = vpop.f32.mrf.mxu0  ;;  %v1040_v13 = vpop.f32.mrf.mxu1 }
 0x178   : > { %v1940_v14 = vpack.c.bf16 %v880_v12, %v878_v10  ;;  %v1972_v15 = vpack.c.bf16 %v1040_v13, %v1038_v11 }
 0x179   : > { %v884_v16 = vpop.f32.mrf.mxu0  ;;  %v1044_v17 = vpop.f32.mrf.mxu1 }
 0x17a   : > { %1554 = vst [vmem:[%s2845_s12 + $0x38] sm:$0xff] %v1940_v14  ;;  %1586 = vst [vmem:[%s2845_s12 + $0x138] sm:$0xff] %v1972_v15 }
 0x17b   : > { %v886_v18 = vpop.f32.mrf.mxu0  ;;  %v1046_v19 = vpop.f32.mrf.mxu1 }
 0x17c   : > { %v1941_v20 = vpack.c.bf16 %v886_v18, %v884_v16  ;;  %v1973_v21 = vpack.c.bf16 %v1046_v19, %v1044_v17 }
 0x17d   : > { %v888_v22 = vpop.f32.mrf.mxu0  ;;  %v1048_v23 = vpop.f32.mrf.mxu1 }
 0x17e   : > { %1555 = vst [vmem:[%s2845_s12 + $0x40] sm:$0xff] %v1941_v20  ;;  %1587 = vst [vmem:[%s2845_s12 + $0x140] sm:$0xff] %v1973_v21 }
 0x17f   : > { %v890_v24 = vpop.f32.mrf.mxu0  ;;  %v1050_v25 = vpop.f32.mrf.mxu1 }
 0x180   : > { %v1942_v26 = vpack.c.bf16 %v890_v24, %v888_v22  ;;  %v1974_v27 = vpack.c.bf16 %v1050_v25, %v1048_v23 }
 0x181   : > { %v894_v28 = vpop.f32.mrf.mxu0  ;;  %v1054_v29 = vpop.f32.mrf.mxu1 }
 0x182   : > { %1556 = vst [vmem:[%s2845_s12 + $0x48] sm:$0xff] %v1942_v26  ;;  %1588 = vst [vmem:[%s2845_s12 + $0x148] sm:$0xff] %v1974_v27 }
 0x183   : > { %v896_v30 = vpop.f32.mrf.mxu0  ;;  %v1056_v31 = vpop.f32.mrf.mxu1 }
 0x184   : > { %v1943_v32 = vpack.c.bf16 %v896_v30, %v894_v28  ;;  %v1975_v33 = vpack.c.bf16 %v1056_v31, %v1054_v29 }
 0x185   : > { %v898_v34 = vpop.f32.mrf.mxu0  ;;  %v1058_v35 = vpop.f32.mrf.mxu1 }
 0x186   : > { %1557 = vst [vmem:[%s2845_s12 + $0x50] sm:$0xff] %v1943_v32  ;;  %1589 = vst [vmem:[%s2845_s12 + $0x150] sm:$0xff] %v1975_v33 }
 0x187   : > { %v900_v36 = vpop.f32.mrf.mxu0  ;;  %v1060_v37 = vpop.f32.mrf.mxu1 }
 0x188   : > { %v1944_v38 = vpack.c.bf16 %v900_v36, %v898_v34  ;;  %v1976_v39 = vpack.c.bf16 %v1060_v37, %v1058_v35 }
 0x189   : > { %v904_v40 = vpop.f32.mrf.mxu0  ;;  %v1064_v41 = vpop.f32.mrf.mxu1 }
 0x18a   : > { %1558 = vst [vmem:[%s2845_s12 + $0x58] sm:$0xff] %v1944_v38  ;;  %1590 = vst [vmem:[%s2845_s12 + $0x158] sm:$0xff] %v1976_v39 }
 0x18b   : > { %v906_v42 = vpop.f32.mrf.mxu0  ;;  %v1066_v43 = vpop.f32.mrf.mxu1 }
 0x18c   : > { %v1945_v44 = vpack.c.bf16 %v906_v42, %v904_v40  ;;  %v1977_v45 = vpack.c.bf16 %v1066_v43, %v1064_v41 }
 0x18d   : > { %v908_v46 = vpop.f32.mrf.mxu0  ;;  %v1068_v47 = vpop.f32.mrf.mxu1 }
 0x18e   : > { %1559 = vst [vmem:[%s2845_s12 + $0x60] sm:$0xff] %v1945_v44  ;;  %1591 = vst [vmem:[%s2845_s12 + $0x160] sm:$0xff] %v1977_v45 }
 0x18f   : > { %v910_v48 = vpop.f32.mrf.mxu0  ;;  %v1070_v49 = vpop.f32.mrf.mxu1 }
 0x190   : > { %v1946_v50 = vpack.c.bf16 %v910_v48, %v908_v46  ;;  %v1978_v51 = vpack.c.bf16 %v1070_v49, %v1068_v47 }
 0x191   : > { %v914_v52 = vpop.f32.mrf.mxu0  ;;  %v1074_v53 = vpop.f32.mrf.mxu1 }
 0x192   : > { %1560 = vst [vmem:[%s2845_s12 + $0x68] sm:$0xff] %v1946_v50  ;;  %1592 = vst [vmem:[%s2845_s12 + $0x168] sm:$0xff] %v1978_v51 }
 0x193   : > { %v916_v54 = vpop.f32.mrf.mxu0  ;;  %v1076_v55 = vpop.f32.mrf.mxu1 }
 0x194   : > { %v1947_v56 = vpack.c.bf16 %v916_v54, %v914_v52  ;;  %v1979_v57 = vpack.c.bf16 %v1076_v55, %v1074_v53 }
 0x195   : > { %v918_v58 = vpop.f32.mrf.mxu0  ;;  %v1078_v59 = vpop.f32.mrf.mxu1 }
 0x196   : > { %1561 = vst [vmem:[%s2845_s12 + $0x70] sm:$0xff] %v1947_v56  ;;  %1593 = vst [vmem:[%s2845_s12 + $0x170] sm:$0xff] %v1979_v57 }
 0x197   : > { %v920_v60 = vpop.f32.mrf.mxu0  ;;  %v1080_v61 = vpop.f32.mrf.mxu1 }
 0x198   : > { %v1948_v62 = vpack.c.bf16 %v920_v60, %v918_v58  ;;  %v1980_v63 = vpack.c.bf16 %v1080_v61, %v1078_v59 }
 0x199   : > { %v924_v0 = vpop.f32.mrf.mxu0  ;;  %v1084_v1 = vpop.f32.mrf.mxu1 }
 0x19a   : > { %1562 = vst [vmem:[%s2845_s12 + $0x78] sm:$0xff] %v1948_v62  ;;  %1594 = vst [vmem:[%s2845_s12 + $0x178] sm:$0xff] %v1980_v63 }
 0x19b   : > { %v926_v2 = vpop.f32.mrf.mxu0  ;;  %v1086_v3 = vpop.f32.mrf.mxu1 }
 0x19c   : > { %v1949_v4 = vpack.c.bf16 %v926_v2, %v924_v0  ;;  %v1981_v5 = vpack.c.bf16 %v1086_v3, %v1084_v1 }
 0x19d   : > { %v928_v6 = vpop.f32.mrf.mxu0  ;;  %v1088_v7 = vpop.f32.mrf.mxu1 }
 0x19e   : > { %1563 = vst [vmem:[%s2845_s12 + $0x80] sm:$0xff] %v1949_v4  ;;  %1595 = vst [vmem:[%s2845_s12 + $0x180] sm:$0xff] %v1981_v5 }
 0x19f   : > { %v930_v8 = vpop.f32.mrf.mxu0  ;;  %v1090_v9 = vpop.f32.mrf.mxu1 }
 0x1a0   : > { %v1950_v10 = vpack.c.bf16 %v930_v8, %v928_v6  ;;  %v1982_v11 = vpack.c.bf16 %v1090_v9, %v1088_v7 }
 0x1a1   : > { %v934_v12 = vpop.f32.mrf.mxu0  ;;  %v1094_v13 = vpop.f32.mrf.mxu1 }
 0x1a2   : > { %1564 = vst [vmem:[%s2845_s12 + $0x88] sm:$0xff] %v1950_v10  ;;  %1596 = vst [vmem:[%s2845_s12 + $0x188] sm:$0xff] %v1982_v11 }
 0x1a3   : > { %v936_v14 = vpop.f32.mrf.mxu0  ;;  %v1096_v15 = vpop.f32.mrf.mxu1 }
 0x1a4   : > { %v1951_v16 = vpack.c.bf16 %v936_v14, %v934_v12  ;;  %v1983_v17 = vpack.c.bf16 %v1096_v15, %v1094_v13 }
 0x1a5   : > { %v938_v18 = vpop.f32.mrf.mxu0  ;;  %v1098_v19 = vpop.f32.mrf.mxu1 }
 0x1a6   : > { %1565 = vst [vmem:[%s2845_s12 + $0x90] sm:$0xff] %v1951_v16  ;;  %1597 = vst [vmem:[%s2845_s12 + $0x190] sm:$0xff] %v1983_v17 }
 0x1a7   : > { %v940_v20 = vpop.f32.mrf.mxu0  ;;  %v1100_v21 = vpop.f32.mrf.mxu1 }
 0x1a8   : > { %v1952_v22 = vpack.c.bf16 %v940_v20, %v938_v18  ;;  %v1984_v23 = vpack.c.bf16 %v1100_v21, %v1098_v19 }
 0x1a9   : > { %v944_v24 = vpop.f32.mrf.mxu0  ;;  %v1104_v25 = vpop.f32.mrf.mxu1 }
 0x1aa   : > { %1566 = vst [vmem:[%s2845_s12 + $0x98] sm:$0xff] %v1952_v22  ;;  %1598 = vst [vmem:[%s2845_s12 + $0x198] sm:$0xff] %v1984_v23 }
 0x1ab   : > { %v946_v26 = vpop.f32.mrf.mxu0  ;;  %v1106_v27 = vpop.f32.mrf.mxu1 }
 0x1ac   : > { %v1953_v28 = vpack.c.bf16 %v946_v26, %v944_v24  ;;  %v1985_v29 = vpack.c.bf16 %v1106_v27, %v1104_v25 }
 0x1ad   : > { %v948_v30 = vpop.f32.mrf.mxu0  ;;  %v1108_v31 = vpop.f32.mrf.mxu1 }
 0x1ae   : > { %1567 = vst [vmem:[%s2845_s12 + $0xa0] sm:$0xff] %v1953_v28  ;;  %1599 = vst [vmem:[%s2845_s12 + $0x1a0] sm:$0xff] %v1985_v29 }
 0x1af   : > { %v950_v32 = vpop.f32.mrf.mxu0  ;;  %v1110_v33 = vpop.f32.mrf.mxu1 }
 0x1b0   : > { %v1954_v34 = vpack.c.bf16 %v950_v32, %v948_v30  ;;  %v1986_v35 = vpack.c.bf16 %v1110_v33, %v1108_v31 }
 0x1b1   : > { %v954_v36 = vpop.f32.mrf.mxu0  ;;  %v1114_v37 = vpop.f32.mrf.mxu1 }
 0x1b2   : > { %1568 = vst [vmem:[%s2845_s12 + $0xa8] sm:$0xff] %v1954_v34  ;;  %1600 = vst [vmem:[%s2845_s12 + $0x1a8] sm:$0xff] %v1986_v35 }
 0x1b3   : > { %v956_v38 = vpop.f32.mrf.mxu0  ;;  %v1116_v39 = vpop.f32.mrf.mxu1 }
 0x1b4   : > { %v1955_v40 = vpack.c.bf16 %v956_v38, %v954_v36  ;;  %v1987_v41 = vpack.c.bf16 %v1116_v39, %v1114_v37 }
 0x1b5   : > { %v958_v42 = vpop.f32.mrf.mxu0  ;;  %v1118_v43 = vpop.f32.mrf.mxu1 }
 0x1b6   : > { %1569 = vst [vmem:[%s2845_s12 + $0xb0] sm:$0xff] %v1955_v40  ;;  %1601 = vst [vmem:[%s2845_s12 + $0x1b0] sm:$0xff] %v1987_v41 }
 0x1b7   : > { %v960_v44 = vpop.f32.mrf.mxu0  ;;  %v1120_v45 = vpop.f32.mrf.mxu1 }
 0x1b8   : > { %v1956_v46 = vpack.c.bf16 %v960_v44, %v958_v42  ;;  %v1988_v47 = vpack.c.bf16 %v1120_v45, %v1118_v43 }
 0x1b9   : > { %v964_v48 = vpop.f32.mrf.mxu0  ;;  %v1124_v49 = vpop.f32.mrf.mxu1 }
 0x1ba   : > { %1570 = vst [vmem:[%s2845_s12 + $0xb8] sm:$0xff] %v1956_v46  ;;  %1602 = vst [vmem:[%s2845_s12 + $0x1b8] sm:$0xff] %v1988_v47 }
 0x1bb   : > { %v966_v50 = vpop.f32.mrf.mxu0  ;;  %v1126_v51 = vpop.f32.mrf.mxu1 }
 0x1bc   : > { %v1957_v52 = vpack.c.bf16 %v966_v50, %v964_v48  ;;  %v1989_v53 = vpack.c.bf16 %v1126_v51, %v1124_v49 }
 0x1bd   : > { %v968_v54 = vpop.f32.mrf.mxu0  ;;  %v1128_v55 = vpop.f32.mrf.mxu1 }
 0x1be   : > { %1571 = vst [vmem:[%s2845_s12 + $0xc0] sm:$0xff] %v1957_v52  ;;  %1603 = vst [vmem:[%s2845_s12 + $0x1c0] sm:$0xff] %v1989_v53 }
 0x1bf   : > { %v970_v56 = vpop.f32.mrf.mxu0  ;;  %v1130_v57 = vpop.f32.mrf.mxu1 }
 0x1c0   : > { %v1958_v58 = vpack.c.bf16 %v970_v56, %v968_v54  ;;  %v1990_v59 = vpack.c.bf16 %v1130_v57, %v1128_v55 }
 0x1c1   : > { %v974_v60 = vpop.f32.mrf.mxu0  ;;  %v1134_v61 = vpop.f32.mrf.mxu1 }
 0x1c2   : > { %1572 = vst [vmem:[%s2845_s12 + $0xc8] sm:$0xff] %v1958_v58  ;;  %1604 = vst [vmem:[%s2845_s12 + $0x1c8] sm:$0xff] %v1990_v59 }
 0x1c3   : > { %v976_v62 = vpop.f32.mrf.mxu0  ;;  %v1136_v63 = vpop.f32.mrf.mxu1 }
 0x1c4   : > { %v1959_v0 = vpack.c.bf16 %v976_v62, %v974_v60  ;;  %v1991_v1 = vpack.c.bf16 %v1136_v63, %v1134_v61 }
 0x1c5   : > { %v978_v2 = vpop.f32.mrf.mxu0  ;;  %v1138_v3 = vpop.f32.mrf.mxu1 }
 0x1c6   : > { %1573 = vst [vmem:[%s2845_s12 + $0xd0] sm:$0xff] %v1959_v0  ;;  %1605 = vst [vmem:[%s2845_s12 + $0x1d0] sm:$0xff] %v1991_v1 }
 0x1c7   : > { %v980_v4 = vpop.f32.mrf.mxu0  ;;  %v1140_v5 = vpop.f32.mrf.mxu1 }
 0x1c8   : > { %v1960_v6 = vpack.c.bf16 %v980_v4, %v978_v2  ;;  %v1992_v7 = vpack.c.bf16 %v1140_v5, %v1138_v3 }
 0x1c9   : > { %v984_v8 = vpop.f32.mrf.mxu0  ;;  %v1144_v9 = vpop.f32.mrf.mxu1 }
 0x1ca   : > { %1574 = vst [vmem:[%s2845_s12 + $0xd8] sm:$0xff] %v1960_v6  ;;  %1606 = vst [vmem:[%s2845_s12 + $0x1d8] sm:$0xff] %v1992_v7 }
 0x1cb   : > { %v986_v10 = vpop.f32.mrf.mxu0  ;;  %v1146_v11 = vpop.f32.mrf.mxu1 }
 0x1cc   : > { %v1961_v12 = vpack.c.bf16 %v986_v10, %v984_v8  ;;  %v1993_v13 = vpack.c.bf16 %v1146_v11, %v1144_v9 }
 0x1cd   : > { %v988_v14 = vpop.f32.mrf.mxu0  ;;  %v1148_v15 = vpop.f32.mrf.mxu1 }
 0x1ce   : > { %1575 = vst [vmem:[%s2845_s12 + $0xe0] sm:$0xff] %v1961_v12  ;;  %1607 = vst [vmem:[%s2845_s12 + $0x1e0] sm:$0xff] %v1993_v13 }
 0x1cf   : > { %v990_v16 = vpop.f32.mrf.mxu0  ;;  %v1150_v17 = vpop.f32.mrf.mxu1 }
 0x1d0   : > { %v1962_v18 = vpack.c.bf16 %v990_v16, %v988_v14  ;;  %v1994_v19 = vpack.c.bf16 %v1150_v17, %v1148_v15 }
 0x1d1   : > { %v994_v20 = vpop.f32.mrf.mxu0  ;;  %v1154_v21 = vpop.f32.mrf.mxu1 }
 0x1d2   : > { %1576 = vst [vmem:[%s2845_s12 + $0xe8] sm:$0xff] %v1962_v18  ;;  %1608 = vst [vmem:[%s2845_s12 + $0x1e8] sm:$0xff] %v1994_v19 }
 0x1d3   : > { %v996_v22 = vpop.f32.mrf.mxu0  ;;  %v1156_v23 = vpop.f32.mrf.mxu1 }
 0x1d4   : > { %v1963_v24 = vpack.c.bf16 %v996_v22, %v994_v20  ;;  %v1995_v25 = vpack.c.bf16 %v1156_v23, %v1154_v21 }
 0x1d5   : > { %v998_v26 = vpop.f32.mrf.mxu0  ;;  %v1158_v27 = vpop.f32.mrf.mxu1 }
 0x1d6   : > { %1577 = vst [vmem:[%s2845_s12 + $0xf0] sm:$0xff] %v1963_v24  ;;  %1609 = vst [vmem:[%s2845_s12 + $0x1f0] sm:$0xff] %v1995_v25 }
 0x1d7   : > { %v1000_v28 = vpop.f32.mrf.mxu0  ;;  %v1160_v29 = vpop.f32.mrf.mxu1 }
 0x1d8   : > { %v1964_v30 = vpack.c.bf16 %v1000_v28, %v998_v26  ;;  %v1996_v31 = vpack.c.bf16 %v1160_v29, %v1158_v27 }
 0x1da   : > { %1578 = vst [vmem:[%s2845_s12 + $0xf8] sm:$0xff] %v1964_v30  ;;  %1610 = vst [vmem:[%s2845_s12 + $0x1f8] sm:$0xff] %v1996_v31 }
 0x1db   : > { %2378 = shalt.err (!%p2375_p4)
}
 0x1dc   : > { %s2379_s7 = scalar_lea.hbm %s2915_s29, 8192  ;;  %s2383_s28 = scalar_lea.hbm %s3000_s2, 49152 }
 0x1dd   : > { %p2380_p1 = scmp.ne.s32.totalorder %s2915_s29, %s2379_s7  ;;  %p2384_p3 = scmp.lt.s32.totalorder %s2915_s29, %s3000_s2 }
 0x1de   : > { %p2385_p12 = scmp.lt.s32.totalorder %s2383_s28, %s2379_s7 }
 0x1df   : > { %p2381_p11 = pnand %p2380_p1, %p3032_p6 }
 0x1e0   : > { %p2386_p13 = por %p2385_p12, %p2384_p3 }
 0x1e1   : > { %p2382_p7 = pneg %p2381_p11 }
 0x1e3   : > { %p2387_p5 = pnand %p2386_p13, %p2382_p7 }
 0x1e5   : > { %2390 = shalt.err (!%p2387_p5)
}
 0x1e6   : > { %s2520_s3 = smov 128   ;;  %s2521_s8 = smov 8  }
 0x1e7   : > { %2034 = dma.vmem_to_hbm [thread:$0]  (%p3032_p6), %s2917_s18, 8192, %s2915_s29, %s2923_s4, %s2520_s3, %s2520_s3, %s2521_s8  }
 0x1e8 PF: > { %p2048_p10 = scmp.ge.s32.totalorder %s2513_s22, 2  ;;  %s1645_s19 = sand.u32 1, %s2461_s9  }
 0x1e9   : > { %p3033_p2 = scmp.ne.s32.totalorder %s3027_s5, 0  ;;  %s1646_s21 = scalar_lea.sflag [#allocation4], %s1645_s19 }
 0x1eb   : > { %p2044_p8 = pnand %p2048_p10, %p3033_p2 }
 0x1ed   : > { %p2045_p0 = pneg %p2044_p8 }
 0x1ef   : > { %2456 = dma.done.wait (%p2045_p0), %s1646_s21, 8192  }
 0x1f0   : > { %2458 = vsyncadd (%p2045_p0), %s1646_s21, 4294959104  ;;  %s21_s22 = sadd.s32 1, %s2513_s22   ;;  %s3035_s24 = sld [smem:[#allocation15_spill]] }
 0x1f1   : > { %p2951_p9 = scmp.ge.s32.totalorder %s21_s22, 8   ;;  %s3036_s18 = sld [smem:[#allocation11_spill]] }
 0x1f2   : > { %s3037_s19 = sld [smem:[#allocation12_spill]]  ;;  %s3040_s9 = smov %s2465_s10 }
 0x1f3   : > { %s3038_s20 = sld [smem:[#allocation13_spill]]  ;;  %s3041_s10 = smov %s2469_s11 }
 0x1f4   : > { %s3039_s21 = sld [smem:[#allocation14_spill]]  ;;  %s3042_s11 = smov %s2701_s0 }
 0x1f5   : > { %s3043_s12 = smov %s2477_s13  ;;  %s3044_s13 = smov %s2481_s14 }
 0x1f6   : > { %s3045_s14 = smov %s2683_s15  ;;  %s3046_s15 = smov %s2489_s16 }
 0x1f7   : > { %s3047_s16 = smov %s2493_s17  ;;  %s3048_s17 = smov %s3035_s24 }
 0x1f8   :  { %20 = sbr.rel (!%p2951_p9) target bundleno = 15 (0xf), region = 86 }
 0x1fd   :  { %1651 = vsyncpa [#allocation3], 1 }
 0x1fe   :  { %1653 = vsyncpa [#allocation3 + $0x1], 1 }
 0x1ff   :  { %1654 = vsyncpa [#allocation6], 1 }
 0x200   :  { %1656 = vsyncpa [#allocation6 + $0x1], 1 }
 0x201   :  { %1657 = vsyncpa [#allocation4], 1 }
 0x202   :  { %1659 = vsyncpa [#allocation4 + $0x1], 1 }

</bundles_post_ra>
